<compile_context>
chip_gen: v6e
topology: v6e:2x2x1
jax: 0.10.0
libtpu: 0.0.40
codegen_flags: <defaults>
</compile_context>

<pallas_src>
import functools

import jax
import jax.numpy as jnp
from jax import lax
from jax.experimental import pallas as pl
from jax.experimental.pallas import tpu as pltpu


def _round_up(x: int, m: int) -> int:
    return ((x + m - 1) // m) * m


def _actor_kernel(x_ref, w1_ref, b1_ref, w2_ref, b2_ref, w3_ref, b3_ref,
                  meanT_ref, *, act_dtype):
    """One batch tile; activations kept batch-on-lanes.

    x_ref:     (TB, state_dim)   -- natural input layout (no wrapper transpose)
    wK_ref:    (out_k, in_k)     -- PyTorch (out, in) order, VMEM-resident
    bK_ref:    (out_k, 1)        -- broadcasts over the lane (batch) axis
    meanT_ref: (action_dim, TB)  -- lane-dense store on the batch axis
    """
    # Layer 1: contract W1's in-dim (dim 1) against x's feature dim (dim 1)
    # -> (h1_dim, TB), batch on lanes.  f32 MXU accumulation.
    h1 = lax.dot_general(
        w1_ref[...], x_ref[...],
        dimension_numbers=(((1,), (1,)), ((), ())),
        preferred_element_type=jnp.float32)
    h1 = jnp.tanh((h1 + b1_ref[...]).astype(act_dtype))

    # Layer 2 + tanh: (h2_dim, TB)
    h2 = jnp.dot(w2_ref[...].astype(act_dtype), h1,
                 preferred_element_type=jnp.float32)
    h2 = jnp.tanh((h2 + b2_ref[...]).astype(act_dtype))

    # Layer 3 (mean head, no activation): (action_dim, TB)
    m = jnp.dot(w3_ref[...].astype(act_dtype), h2,
                preferred_element_type=jnp.float32)
    meanT_ref[...] = (m + b3_ref[...]).astype(meanT_ref.dtype)


def actor_forward(state, params, *, tile_b: int = 8192, min_tiles: int = 2,
                  act_dtype=jnp.float32, expand_std: bool = False):
    """Returns (mean, std).

    mean: (B, action_dim) = MLP(state)
    std:  exp(logstd), shape (1, action_dim) by default (broadcasts against
          mean exactly like the PyTorch Normal); pass expand_std=True to get
          the fully materialized (B, action_dim) tensor.
    """
    w1, b1, w2, b2, w3, b3, logstd = params
    B, state_dim = state.shape
    action_dim = w3.shape[0]
    h1_dim, h2_dim = w1.shape[0], w2.shape[0]

    # --- batch tiling ------------------------------------------------------
    # Pad the batch only to a lane multiple (128); pick tiles that cover it
    # with minimal waste.  Keep grid >= min_tiles (2) when the batch allows it
    # so v7x can shard the "parallel" axis across both TensorCores.
    B128 = _round_up(max(B, 1), 128)
    n_tiles = max(pl.cdiv(B128, tile_b), 1)
    if B128 >= 128 * min_tiles:
        n_tiles = max(n_tiles, min_tiles)
    TB = _round_up(pl.cdiv(B128, n_tiles), 128)
    B_pad = n_tiles * TB

    x = state
    if B_pad != B:
        x = jnp.pad(x, ((0, B_pad - B), (0, 0)))

    # Advisory cost so XLA schedules the call sensibly next to wrapper ops.
    cost = pl.CostEstimate(
        flops=2 * B_pad * (state_dim * h1_dim + h1_dim * h2_dim
                           + h2_dim * action_dim),
        transcendentals=B_pad * (h1_dim + h2_dim),
        bytes_accessed=4 * (B_pad * state_dim + B_pad * action_dim
                            + w1.size + w2.size + w3.size
                            + b1.size + b2.size + b3.size),
    )

    const2d = lambda shp: pl.BlockSpec(shp, lambda i: (0, 0))  # resident weights

    meanT = pl.pallas_call(
        functools.partial(_actor_kernel, act_dtype=act_dtype),
        out_shape=jax.ShapeDtypeStruct((action_dim, B_pad), jnp.float32),
        grid=(n_tiles,),
        in_specs=[
            pl.BlockSpec((TB, state_dim), lambda i: (i, 0)),   # state, tiled on batch
            const2d(w1.shape), const2d(b1.shape),
            const2d(w2.shape), const2d(b2.shape),
            const2d(w3.shape), const2d(b3.shape),
        ],
        out_specs=pl.BlockSpec((action_dim, TB), lambda i: (0, i)),
        compiler_params=pltpu.CompilerParams(
            dimension_semantics=("parallel",)),                # 2-TC shard on v7x
        cost_estimate=cost,
    )(x, w1, b1, w2, b2, w3, b3)

    # Consumer-facing (B, action_dim); kernel stores stay lane-dense.
    mean = jnp.transpose(meanT[:, :B])

    # std is a batch-constant; keep it (1, action_dim) unless asked otherwise.
    std = jnp.exp(logstd)
    if expand_std:
        std = jnp.broadcast_to(std, mean.shape)
    return mean, std


def init_params(key, state_dim, action_dim, fc_dims):
    """Orthogonal init mirroring layer_init (std=sqrt(2) hidden, 0.01 last).

    Weights stay in PyTorch (out, in) order (the kernel consumes them directly);
    biases are (out, 1) columns so they broadcast over the lane (batch) axis.
    """
    keys = jax.random.split(key, len(fc_dims) + 1)
    params = []
    in_f = state_dim
    dims = list(fc_dims) + [action_dim]
    gains = [float(jnp.sqrt(2.0))] * len(fc_dims) + [0.01]
    for k, out_f, gain in zip(keys, dims, gains):
        w = jax.nn.initializers.orthogonal(scale=gain)(k, (out_f, in_f), jnp.float32)
        b = jnp.zeros((out_f, 1), jnp.float32)                 # bias_const = 0.0
        params.extend([w, b])
        in_f = out_f
    logstd = jnp.zeros((1, action_dim), jnp.float32)           # nn.Parameter(zeros(1, A))
    return tuple(params + [logstd])


if __name__ == "__main__":
    # Small shapes consistent with the module's forward: state (B, state_dim).
    B, state_dim, action_dim = 8, 16, 8
    fc_dims = [32, 32]

    key = jax.random.PRNGKey(0)
    k_state, k_params = jax.random.split(key)

    state = jax.random.normal(k_state, (B, state_dim), jnp.float32)
    params = init_params(k_params, state_dim, action_dim, fc_dims)

    mean, std = jax.jit(actor_forward)(state, params)
    jax.block_until_ready((mean, std))

    # Pure-JAX reference check (weights are (out, in): y = x @ W.T + b.T).
    w1, b1, w2, b2, w3, b3, logstd = params
    h = jnp.tanh(state @ w1.T + b1.T)
    h = jnp.tanh(h @ w2.T + b2.T)
    mean_ref = h @ w3.T + b3.T
    std_ref = jnp.exp(logstd)

    assert mean.shape == (B, action_dim)
    assert std.shape == (1, action_dim)          # broadcasts against mean (Normal semantics)
    assert jnp.allclose(mean, mean_ref, atol=1e-5, rtol=1e-5)
    assert jnp.allclose(std, std_ref, atol=1e-6, rtol=1e-6)
    assert jnp.allclose(jnp.broadcast_to(std, mean.shape),
                        jnp.broadcast_to(jnp.exp(logstd), mean_ref.shape),
                        atol=1e-6, rtol=1e-6)

    print("KERNEL_OK")
</pallas_src>

<mosaic_0001>
module attributes {stable_mosaic.version = 11 : i64} {
  func.func @_actor_kernel(%arg0: i32, %arg1: memref<128x16xf32, #tpu.memory_space<vmem>>, %arg2: memref<32x16xf32, #tpu.memory_space<vmem>>, %arg3: memref<32x1xf32, #tpu.memory_space<vmem>>, %arg4: memref<32x32xf32, #tpu.memory_space<vmem>>, %arg5: memref<32x1xf32, #tpu.memory_space<vmem>>, %arg6: memref<8x32xf32, #tpu.memory_space<vmem>>, %arg7: memref<8x1xf32, #tpu.memory_space<vmem>>, %arg8: memref<8x128xf32, #tpu.memory_space<vmem>>) attributes {dimension_semantics = [#tpu.dimension_semantics<parallel>], iteration_bounds = array<i64: 1>, scalar_prefetch = 0 : i64, scratch_operands = 0 : i64, tpu.core_type = #tpu.core_type<tc>, window_params = [{transform_indices = @transform_0, window_bounds = array<i64: 128, 16>}, {pipeline_mode = #tpu.pipeline_mode<synchronous>, transform_indices = @transform_1, window_bounds = array<i64: 32, 16>}, {pipeline_mode = #tpu.pipeline_mode<synchronous>, transform_indices = @transform_2, window_bounds = array<i64: 32, 1>}, {pipeline_mode = #tpu.pipeline_mode<synchronous>, transform_indices = @transform_3, window_bounds = array<i64: 32, 32>}, {pipeline_mode = #tpu.pipeline_mode<synchronous>, transform_indices = @transform_4, window_bounds = array<i64: 32, 1>}, {pipeline_mode = #tpu.pipeline_mode<synchronous>, transform_indices = @transform_5, window_bounds = array<i64: 8, 32>}, {pipeline_mode = #tpu.pipeline_mode<synchronous>, transform_indices = @transform_6, window_bounds = array<i64: 8, 1>}, {transform_indices = @transform_7, window_bounds = array<i64: 8, 128>}]} {
    %c0 = arith.constant 0 : index
    %c0_0 = arith.constant 0 : index
    %0 = vector.load %arg2[%c0, %c0_0] : memref<32x16xf32, #tpu.memory_space<vmem>>, vector<32x16xf32>
    %c0_1 = arith.constant 0 : index
    %c0_2 = arith.constant 0 : index
    %1 = vector.load %arg1[%c0_1, %c0_2] : memref<128x16xf32, #tpu.memory_space<vmem>>, vector<128x16xf32>
    %cst = arith.constant dense<0.000000e+00> : vector<32x128xf32>
    %2 = tpu.matmul %0, %1, %cst {dimension_numbers = #tpu.dot_dimension_numbers<[1], [1], [0], [0], [0, 0, 1, 0], [], []>} : vector<32x16xf32>, vector<128x16xf32>, vector<32x128xf32> -> vector<32x128xf32>
    %c0_3 = arith.constant 0 : index
    %c0_4 = arith.constant 0 : index
    %3 = vector.load %arg3[%c0_3, %c0_4] : memref<32x1xf32, #tpu.memory_space<vmem>>, vector<32x1xf32>
    %4 = vector.broadcast %3 : vector<32x1xf32> to vector<32x128xf32>
    %5 = arith.addf %2, %4 : vector<32x128xf32>
    %6 = math.tanh %5 : vector<32x128xf32>
    %c0_5 = arith.constant 0 : index
    %c0_6 = arith.constant 0 : index
    %7 = vector.load %arg4[%c0_5, %c0_6] : memref<32x32xf32, #tpu.memory_space<vmem>>, vector<32x32xf32>
    %cst_7 = arith.constant dense<0.000000e+00> : vector<32x128xf32>
    %8 = tpu.matmul %7, %6, %cst_7 {dimension_numbers = #tpu.dot_dimension_numbers<[1], [0], [0], [1], [0, 0, 1, 1], [], []>} : vector<32x32xf32>, vector<32x128xf32>, vector<32x128xf32> -> vector<32x128xf32>
    %c0_8 = arith.constant 0 : index
    %c0_9 = arith.constant 0 : index
    %9 = vector.load %arg5[%c0_8, %c0_9] : memref<32x1xf32, #tpu.memory_space<vmem>>, vector<32x1xf32>
    %10 = vector.broadcast %9 : vector<32x1xf32> to vector<32x128xf32>
    %11 = arith.addf %8, %10 : vector<32x128xf32>
    %12 = math.tanh %11 : vector<32x128xf32>
    %c0_10 = arith.constant 0 : index
    %c0_11 = arith.constant 0 : index
    %13 = vector.load %arg6[%c0_10, %c0_11] : memref<8x32xf32, #tpu.memory_space<vmem>>, vector<8x32xf32>
    %cst_12 = arith.constant dense<0.000000e+00> : vector<8x128xf32>
    %14 = tpu.matmul %13, %12, %cst_12 {dimension_numbers = #tpu.dot_dimension_numbers<[1], [0], [0], [1], [0, 0, 1, 1], [], []>} : vector<8x32xf32>, vector<32x128xf32>, vector<8x128xf32> -> vector<8x128xf32>
    %c0_13 = arith.constant 0 : index
    %c0_14 = arith.constant 0 : index
    %15 = vector.load %arg7[%c0_13, %c0_14] : memref<8x1xf32, #tpu.memory_space<vmem>>, vector<8x1xf32>
    %16 = vector.broadcast %15 : vector<8x1xf32> to vector<8x128xf32>
    %17 = arith.addf %14, %16 : vector<8x128xf32>
    %c0_15 = arith.constant 0 : index
    %c0_16 = arith.constant 0 : index
    %18 = vector.load %arg8[%c0_15, %c0_16] : memref<8x128xf32, #tpu.memory_space<vmem>>, vector<8x128xf32>
    tpu.vector_store %arg8[%c0_15, %c0_16], %17 {strides = array<i32>} : memref<8x128xf32, #tpu.memory_space<vmem>>, vector<8x128xf32>,
    return
  }
  func.func @transform_0(%arg0: i32) -> (i32, i32) {
    %c0_i32 = arith.constant 0 : i32
    %c0_i32_0 = arith.constant 0 : i32
    return %arg0, %c0_i32 : i32, i32
  }
  func.func @transform_1(%arg0: i32) -> (i32, i32) {
    %c0_i32 = arith.constant 0 : i32
    %c0_i32_0 = arith.constant 0 : i32
    %c0_i32_1 = arith.constant 0 : i32
    return %c0_i32, %c0_i32_0 : i32, i32
  }
  func.func @transform_2(%arg0: i32) -> (i32, i32) {
    %c0_i32 = arith.constant 0 : i32
    %c0_i32_0 = arith.constant 0 : i32
    %c0_i32_1 = arith.constant 0 : i32
    return %c0_i32, %c0_i32_0 : i32, i32
  }
  func.func @transform_3(%arg0: i32) -> (i32, i32) {
    %c0_i32 = arith.constant 0 : i32
    %c0_i32_0 = arith.constant 0 : i32
    %c0_i32_1 = arith.constant 0 : i32
    return %c0_i32, %c0_i32_0 : i32, i32
  }
  func.func @transform_4(%arg0: i32) -> (i32, i32) {
    %c0_i32 = arith.constant 0 : i32
    %c0_i32_0 = arith.constant 0 : i32
    %c0_i32_1 = arith.constant 0 : i32
    return %c0_i32, %c0_i32_0 : i32, i32
  }
  func.func @transform_5(%arg0: i32) -> (i32, i32) {
    %c0_i32 = arith.constant 0 : i32
    %c0_i32_0 = arith.constant 0 : i32
    %c0_i32_1 = arith.constant 0 : i32
    return %c0_i32, %c0_i32_0 : i32, i32
  }
  func.func @transform_6(%arg0: i32) -> (i32, i32) {
    %c0_i32 = arith.constant 0 : i32
    %c0_i32_0 = arith.constant 0 : i32
    %c0_i32_1 = arith.constant 0 : i32
    return %c0_i32, %c0_i32_0 : i32, i32
  }
  func.func @transform_7(%arg0: i32) -> (i32, i32) {
    %c0_i32 = arith.constant 0 : i32
    %c0_i32_0 = arith.constant 0 : i32
    return %c0_i32, %arg0 : i32, i32
  }
}

</mosaic_0001>

<bundles_post_ra>
// kernel: actor_forward.1
= control target key start
LH: loop header
LB: loop body
LE: loop exit
PB: predicated region body
PF: predicated region fallthrough
CT: control target
= control target key end

     0   :  { %vm70_vm0 = vcmask 130048   ;;  %v577_v2 = vmov 0   ;;  %vm248_vm1 = vcmask 261120   ;;  %v578_v50 = vmov 0.0   ;;  %s766_s0 = inlined_call_operand.vmem [shape: f32[128,16], index: 0, kind: input, shape index: {}]   ;;  %s767_s1 = inlined_call_operand.vmem [shape: f32[32,16], index: 1, kind: input, shape index: {}]   ;;  %s768_s2 = inlined_call_operand.vmem [shape: f32[32,1], index: 2, kind: input, shape index: {}]   ;;  %s769_s4 = inlined_call_operand.vmem [shape: f32[32,1], index: 4, kind: input, shape index: {}]   ;;  %s770_s6 = inlined_call_operand.vmem [shape: f32[8,1], index: 6, kind: input, shape index: {}]   ;;  %s771_s3 = inlined_call_operand.vmem [shape: f32[32,32], index: 3, kind: input, shape index: {}]   ;;  %s772_s5 = inlined_call_operand.vmem [shape: f32[8,32], index: 5, kind: input, shape index: {}]   ;;  %s773_s7 = inlined_call_operand.vmem [shape: f32[8,128], index: 7, kind: output, shape index: {}]  }
   0x1   :  { %v45_v0 = vld [vmem:[%s766_s0 + $0x78] sm:$0xff]  ;;  %v44_v1 = vld [vmem:[%s766_s0 + $0x70] sm:$0xff]  ;;  %559 = vset.pattern.permute.xlu0 %v577_v2  ;;  %560 = vset.pattern.permute.xlu1 %v577_v2  ;;  %v43_v3 = vld [vmem:[%s766_s0 + $0x68] sm:$0xff]  ;;  %vm579_vm2 = vmmov 0  }
   0x2   :  { %493 = vmatprep.subr.msk.mxu0 %vm70_vm0, %v45_v0  ;;  %v26_v4 = vld [vmem:[%s767_s1] sm:$0xff]  ;;  %v49_v5 = vld [vmem:[%s768_s2 + $0x18] sm:$0xff]  ;;  %v47_v6 = vld [vmem:[%s768_s2 + $0x8] sm:$0xff] }
   0x3   :  { %494 = vmatpush3.xpose.msk.msra.mxu0 %vm70_vm0, %v45_v0  ;;  %525 = vmatprep.mubr.msk.f32.mxu0 %vm70_vm0, %v26_v4  ;;  %v42_v7 = vld [vmem:[%s766_s0 + $0x60] sm:$0xff]  ;;  %v48_v8 = vld [vmem:[%s768_s2 + $0x10] sm:$0xff]  ;;  %v41_v10 = vld [vmem:[%s766_s0 + $0x58] sm:$0xff] }
   0x4   :  { %495 = vmatprep.subr.msk.mxu0 %vm70_vm0, %v44_v1  ;;  %67 = vperm.xlu0 %559, %v49_v5   ;;  %v46_v9 = vld [vmem:[%s768_s2] sm:$0xff]  ;;  %v227_v11 = vld [vmem:[%s769_s4 + $0x18] sm:$0xff]  ;;  %v226_v12 = vld [vmem:[%s769_s4 + $0x10] sm:$0xff] }
   0x5   :  { %57 = vperm.xlu1 %560, %v47_v6   ;;  %v40_v13 = vld [vmem:[%s766_s0 + $0x50] sm:$0xff]  ;;  %v225_v14 = vld [vmem:[%s769_s4 + $0x8] sm:$0xff]  ;;  %v224_v15 = vld [vmem:[%s769_s4] sm:$0xff] }
   0x6   :  { %v39_v16 = vld [vmem:[%s766_s0 + $0x48] sm:$0xff]  ;;  %v351_v17 = vld [vmem:[%s770_s6] sm:$0xff]  ;;  %v37_v19 = vld [vmem:[%s766_s0 + $0x38] sm:$0xff] }
   0x7   :  { %496 = vmatpush3.xpose.msk.msra.mxu0 %vm70_vm0, %v44_v1  ;;  %v38_v18 = vld [vmem:[%s766_s0 + $0x40] sm:$0xff]  ;;  %v36_v20 = vld [vmem:[%s766_s0 + $0x30] sm:$0xff]  ;;  %v35_v21 = vld [vmem:[%s766_s0 + $0x28] sm:$0xff] }
   0x8   :  { %497 = vmatprep.subr.msk.mxu0 %vm70_vm0, %v43_v3  ;;  %62 = vperm.xlu0 %559, %v48_v8   ;;  %v34_v22 = vld [vmem:[%s766_s0 + $0x20] sm:$0xff]  ;;  %v33_v23 = vld [vmem:[%s766_s0 + $0x18] sm:$0xff]  ;;  %v32_v24 = vld [vmem:[%s766_s0 + $0x10] sm:$0xff] }
   0x9   :  { %52 = vperm.xlu1 %560, %v46_v9   ;;  %v31_v25 = vld [vmem:[%s766_s0 + $0x8] sm:$0xff]  ;;  %v30_v26 = vld [vmem:[%s766_s0] sm:$0xff]  ;;  %v28_v28 = vld [vmem:[%s767_s1 + $0x10] sm:$0xff] }
   0xa   :  { %v27_v27 = vld [vmem:[%s767_s1 + $0x8] sm:$0xff]  ;;  %v29_v29 = vld [vmem:[%s767_s1 + $0x18] sm:$0xff]  ;;  %v220_v30 = vld [vmem:[%s771_s3] sm:$0xff] }
   0xb   :  { %498 = vmatpush3.xpose.msk.msra.mxu0 %vm70_vm0, %v43_v3  ;;  %539 = vmatprep.mubr.msk.f32.mxu1 %vm248_vm1, %v220_v30  ;;  %v221_v47 = vld [vmem:[%s771_s3 + $0x8] sm:$0xff]  ;;  %v222_v48 = vld [vmem:[%s771_s3 + $0x10] sm:$0xff]  ;;  %v223_v49 = vld [vmem:[%s771_s3 + $0x18] sm:$0xff] }
   0xc   :  { %499 = vmatprep.subr.msk.mxu0 %vm70_vm0, %v42_v7  ;;  %245 = vperm.xlu0 %559, %v227_v11   ;;  %v350_v2 = vld [vmem:[%s772_s5] sm:$0xff] }
   0xd   :  { %240 = vperm.xlu1 %560, %v226_v12  }
   0xf   :  { %500 = vmatpush3.xpose.msk.msra.mxu0 %vm70_vm0, %v42_v7 }
  0x10   :  { %501 = vmatprep.subr.msk.mxu0 %vm70_vm0, %v41_v10  ;;  %235 = vperm.xlu0 %559, %v225_v14  }
  0x11   :  { %230 = vperm.xlu1 %560, %v224_v15  }
  0x13   :  { %502 = vmatpush3.xpose.msk.msra.mxu0 %vm70_vm0, %v41_v10 }
  0x14   :  { %503 = vmatprep.subr.msk.mxu0 %vm70_vm0, %v40_v13  ;;  %354 = vperm.xlu0 %559, %v351_v17  }
  0x17   :  { %504 = vmatpush3.xpose.msk.msra.mxu0 %vm70_vm0, %v40_v13 }
  0x18   :  { %505 = vmatprep.subr.msk.mxu0 %vm70_vm0, %v39_v16 }
  0x1b   :  { %506 = vmatpush3.xpose.msk.msra.mxu0 %vm70_vm0, %v39_v16 }
  0x1c   :  { %507 = vmatprep.subr.msk.mxu0 %vm70_vm0, %v38_v18 }
  0x1f   :  { %508 = vmatpush3.xpose.msk.msra.mxu0 %vm70_vm0, %v38_v18 }
  0x20   :  { %509 = vmatprep.subr.msk.mxu0 %vm70_vm0, %v37_v19 }
  0x23   :  { %510 = vmatpush3.xpose.msk.msra.mxu0 %vm70_vm0, %v37_v19 }
  0x24   :  { %511 = vmatprep.subr.msk.mxu0 %vm70_vm0, %v36_v20 }
  0x27   :  { %512 = vmatpush3.xpose.msk.msra.mxu0 %vm70_vm0, %v36_v20 }
  0x28   :  { %513 = vmatprep.subr.msk.mxu0 %vm70_vm0, %v35_v21 }
  0x2b   :  { %514 = vmatpush3.xpose.msk.msra.mxu0 %vm70_vm0, %v35_v21 }
  0x2c   :  { %515 = vmatprep.subr.msk.mxu0 %vm70_vm0, %v34_v22 }
  0x2f   :  { %516 = vmatpush3.xpose.msk.msra.mxu0 %vm70_vm0, %v34_v22 }
  0x30   :  { %517 = vmatprep.subr.msk.mxu0 %vm70_vm0, %v33_v23 }
  0x33   :  { %518 = vmatpush3.xpose.msk.msra.mxu0 %vm70_vm0, %v33_v23 }
  0x34   :  { %519 = vmatprep.subr.msk.mxu0 %vm70_vm0, %v32_v24 }
  0x37   :  { %520 = vmatpush3.xpose.msk.msra.mxu0 %vm70_vm0, %v32_v24 }
  0x38   :  { %521 = vmatprep.subr.msk.mxu0 %vm70_vm0, %v31_v25 }
  0x3b   :  { %522 = vmatpush3.xpose.msk.msra.mxu0 %vm70_vm0, %v31_v25 }
  0x3c   :  { %523 = vmatprep.subr.msk.mxu0 %vm70_vm0, %v30_v26 }
  0x3f   :  { %524 = vmatpush3.xpose.msk.msra.mxu0 %vm70_vm0, %v30_v26 }
  0x42   :  { %526 = vmatmul.mubr.msk.f32.vlgmr.msra.gmra.mxu0 %vm70_vm0, %v27_v27 }
  0x43   :  { %528 = vmatprep.mubr.msk.f32.mxu0 %vm70_vm0, %v28_v28 }
  0x46   :  { %529 = vmatmul.mubr.msk.f32.gmra.mxu0 %vm70_vm0, %v29_v29 }
  0x7f   :  { %v68_v31 = vpop.permute.xlu0 %67 }
  0x80   :  { %v58_v33 = vpop.permute.xlu1 %57 }
  0x83   :  { %v63_v37 = vpop.permute.xlu0 %62 }
  0x84   :  { %v53_v41 = vpop.permute.xlu1 %52 }
  0x87   :  { %v246_v51 = vpop.permute.xlu0 %245 }
  0x88   :  { %v241_v53 = vpop.permute.xlu1 %240 }
  0x8b   :  { %v236_v57 = vpop.permute.xlu0 %235 }
  0x8c   :  { %v231_v61 = vpop.permute.xlu1 %230 }
  0x8f   :  { %v355_v4 = vpop.permute.xlu0 %354 }
 0x102   :  { %v527_v32 = vpop.f32.mrf.mxu0 }
 0x103   :  { %v203_v39 = vadd.f32 %v527_v32, %v58_v33 }
 0x104   :  { %v197_v34 = vpop.f32.mrf.mxu0 }
 0x105   :  { %v198_v42 = vadd.f32 %v197_v34, %v53_v41 }
 0x106   :  { %v530_v35 = vpop.f32.mrf.mxu0 }
 0x107   :  { %v213_v36 = vadd.f32 %v530_v35, %v68_v31 }
 0x108   :  { %v207_v38 = vpop.f32.mrf.mxu0 }
 0x109   :  { %561 = vtanh.f32 %v213_v36  ;;  %v208_v40 = vadd.f32 %v207_v38, %v63_v37 }
 0x10b   :  { %563 = vtanh.f32 %v208_v40 }
 0x10c   :  { %565 = vtanh.f32 %v203_v39 }
 0x10d   :  { %567 = vtanh.f32 %v198_v42 }
 0x116   :  { %v562_v43 = vpop.eup %561 }
 0x117   :  { %531 = vmatprep.subr.mxu1 %v562_v43 }
 0x118   :  { %v564_v44 = vpop.eup %563  ;;  %532 = vmatpush3.msra.mxu1 %v562_v43 }
 0x119   :  { %533 = vmatprep.subr.mxu1 %v564_v44  ;;  %v566_v45 = vpop.eup %565 }
 0x11a   :  { %534 = vmatpush3.msra.mxu1 %v564_v44  ;;  %v568_v46 = vpop.eup %567 }
 0x11b   :  { %535 = vmatprep.subr.mxu1 %v566_v45 }
 0x11c   :  { %536 = vmatpush3.msra.mxu1 %v566_v45 }
 0x11d   :  { %537 = vmatprep.subr.mxu1 %v568_v46 }
 0x11e   :  { %538 = vmatpush3.msra.mxu1 %v568_v46 }
 0x11f   :  { %540 = vmatmul.mubr.msk.f32.vlgmr.msra.gmra.mxu1 %vm248_vm1, %v221_v47  ;;  %545 = vmatprep.subr.mxu1 %v578_v50 }
 0x120   :  { %542 = vmatprep.mubr.msk.f32.mxu1 %vm248_vm1, %v222_v48 }
 0x123   :  { %543 = vmatmul.mubr.msk.f32.gmra.mxu1 %vm248_vm1, %v223_v49 }
 0x124   :  { %553 = vmatprep.mubr.msk.f32.mxu1 %vm579_vm2, %v578_v50 }
 0x1df   :  { %v541_v52 = vpop.f32.mrf.mxu1 }
 0x1e0   :  { %v333_v59 = vadd.f32 %v541_v52, %v236_v57 }
 0x1e1   :  { %v327_v54 = vpop.f32.mrf.mxu1 }
 0x1e2   :  { %v328_v62 = vadd.f32 %v327_v54, %v231_v61 }
 0x1e3   :  { %v544_v55 = vpop.f32.mrf.mxu1 }
 0x1e4   :  { %v343_v56 = vadd.f32 %v544_v55, %v246_v51 }
 0x1e5   :  { %v337_v58 = vpop.f32.mrf.mxu1 }
 0x1e6   :  { %569 = vtanh.f32 %v343_v56  ;;  %v338_v60 = vadd.f32 %v337_v58, %v241_v53 }
 0x1e8   :  { %571 = vtanh.f32 %v338_v60 }
 0x1e9   :  { %573 = vtanh.f32 %v333_v59 }
 0x1ea   :  { %575 = vtanh.f32 %v328_v62 }
 0x1f3   :  { %v570_v63 = vpop.eup %569 }
 0x1f4   :  { %546 = vmatpush3.msra.mxu1 %v570_v63 }
 0x1f5   :  { %v572_v0 = vpop.eup %571  ;;  %547 = vmatprep.subr.mxu1 %v578_v50 }
 0x1f6   :  { %548 = vmatpush3.msra.mxu1 %v572_v0  ;;  %v574_v1 = vpop.eup %573 }
 0x1f7   :  { %549 = vmatprep.subr.mxu1 %v578_v50  ;;  %v576_v3 = vpop.eup %575 }
 0x1f8   :  { %550 = vmatpush3.msra.mxu1 %v574_v1 }
 0x1f9   :  { %551 = vmatprep.subr.mxu1 %v578_v50 }
 0x1fa   :  { %552 = vmatpush3.msra.mxu1 %v576_v3 }
 0x1fb   :  { %554 = vmatmul.mubr.msk.f32.vlgmr.msra.gmra.mxu1 %vm248_vm1, %v350_v2 }
 0x2bb   :  { %v426_v5 = vpop.f32.mrf.mxu1 }
 0x2bc   :  { %v427_v6 = vadd.f32 %v426_v5, %v355_v4 }
 0x2bd   :  { %v555_v7 = vpop.f32.mrf.mxu1 }
 0x2be   :  { %430 = vst [vmem:[%s773_s7] sm:$0xff] %v427_v6 }

</bundles_post_ra>
